<compile_context>
chip_gen: v5e
topology: v5e:2x2
jax: 0.10.0
libtpu: 0.0.40
codegen_flags: <defaults>
</compile_context>

<pallas_src>
import functools

import jax
import jax.numpy as jnp
from jax.experimental import pallas as pl
from jax.experimental.pallas import tpu as pltpu

_LANE = 128
_SUBLANE = 8


def _round_up(v, m):
    return ((v + m - 1) // m) * m


def fuse_nnlinear_weights(A_w, B_w, C_w):
    """Build the fused, lane-padded weight slab ONCE (init time, not per call).

    A_w: [nx, nx], B_w: [nx, nu], C_w: [ny, nx]  (PyTorch nn.Linear layout).
    Returns W of shape [nx+nu, round_up(nx+ny, 128)] such that
        [x | u] @ W = [dx | y | 0...].
    """
    nx = A_w.shape[0]
    ny = C_w.shape[0]
    nu = B_w.shape[1]
    n_out = nx + ny
    n_out_pad = _round_up(n_out, _LANE)
    W = jnp.zeros((nx + nu, n_out_pad), dtype=A_w.dtype)
    W = W.at[:nx, :nx].set(A_w.T)          # dx contribution from x : x @ A^T
    W = W.at[:nx, nx:n_out].set(C_w.T)     # y  contribution from x : x @ C^T
    W = W.at[nx:, :nx].set(B_w.T)          # dx contribution from u : u @ B^T
    return W


def _nnlinear_fused_kernel(z_ref, w_ref, out_ref):
    # Single MXU push: [TB, nx+nu] @ [nx+nu, n_out_pad] -> lane-dense [TB, n_out_pad].
    out_ref[...] = jnp.dot(
        z_ref[...], w_ref[...], preferred_element_type=jnp.float32
    ).astype(out_ref.dtype)


def nnlinear_forward(u, x, W_fused, state_dim, output_dim, *, batch_tile=256):
    """u: [batch, nu], x: [batch, nx], W_fused from fuse_nnlinear_weights."""
    batch, input_dim = u.shape
    nz = state_dim + input_dim
    n_out_pad = W_fused.shape[1]

    # Tiny per-call concat (batch x (nx+nu)); lets the kernel be a single matmul.
    z = jnp.concatenate([x, u], axis=-1)                     # [batch, nx+nu]

    # Batch tile: multiple of 8 sublanes; conservative for v7x's 32 MiB scoped VMEM.
    tb = min(batch_tile, batch)
    if tb != batch:
        tb = _round_up(tb, _SUBLANE)
    grid = (pl.cdiv(batch, tb),)

    cost = pl.CostEstimate(
        flops=2 * batch * nz * n_out_pad,
        transcendentals=0,
        bytes_accessed=4 * (batch * nz + nz * n_out_pad + batch * n_out_pad),
    )

    slab = pl.pallas_call(
        _nnlinear_fused_kernel,
        out_shape=jax.ShapeDtypeStruct((batch, n_out_pad), x.dtype),
        grid=grid,
        in_specs=[
            pl.BlockSpec((tb, nz), lambda i: (i, 0)),          # activations, tiled
            pl.BlockSpec((nz, n_out_pad), lambda i: (0, 0)),   # fused weight, resident
        ],
        out_specs=pl.BlockSpec((tb, n_out_pad), lambda i: (i, 0)),
        compiler_params=pltpu.CompilerParams(
            dimension_semantics=("parallel",),
        ),
        cost_estimate=cost,
    )(z, W_fused)

    dx = slab[:, :state_dim]
    y = slab[:, state_dim:state_dim + output_dim]
    return dx, y


if __name__ == "__main__":
    # Small shapes consistent with the module: batch=8, input_dim=16, nx=32, output_dim=8.
    batch, input_dim, nx, output_dim = 8, 16, 32, 8

    key = jax.random.PRNGKey(0)
    k_u, k_x, k_a, k_b, k_c = jax.random.split(key, 5)

    u = jax.random.normal(k_u, (batch, input_dim), dtype=jnp.float32)
    x = jax.random.normal(k_x, (batch, nx), dtype=jnp.float32)

    # nn.Linear weight layout: [out_features, in_features].
    A_w = jax.random.normal(k_a, (nx, nx), dtype=jnp.float32) * 0.1
    B_w = jax.random.normal(k_b, (nx, input_dim), dtype=jnp.float32) * 0.1
    C_w = jax.random.normal(k_c, (output_dim, nx), dtype=jnp.float32) * 0.1

    # Weight fusion happens once (init time), not per forward call.
    W_fused = jax.block_until_ready(fuse_nnlinear_weights(A_w, B_w, C_w))

    fwd = jax.jit(
        functools.partial(nnlinear_forward, state_dim=nx, output_dim=output_dim)
    )
    dx, y = fwd(u, x, W_fused)
    jax.block_until_ready((dx, y))

    # Reference check (plain JAX) to confirm semantics.
    dx_ref = x @ A_w.T + u @ B_w.T
    y_ref = x @ C_w.T
    assert jnp.allclose(dx, dx_ref, atol=1e-5, rtol=1e-5)
    assert jnp.allclose(y, y_ref, atol=1e-5, rtol=1e-5)

    print("KERNEL_OK")
</pallas_src>

<mosaic_0001>
module attributes {stable_mosaic.version = 11 : i64} {
  func.func @_nnlinear_fused_kernel(%arg0: i32, %arg1: memref<8x48xf32, #tpu.memory_space<vmem>>, %arg2: memref<48x128xf32, #tpu.memory_space<vmem>>, %arg3: memref<8x128xf32, #tpu.memory_space<vmem>>) attributes {dimension_semantics = [#tpu.dimension_semantics<parallel>], iteration_bounds = array<i64: 1>, scalar_prefetch = 0 : i64, scratch_operands = 0 : i64, tpu.core_type = #tpu.core_type<tc>, window_params = [{transform_indices = @transform_0, window_bounds = array<i64: 8, 48>}, {pipeline_mode = #tpu.pipeline_mode<synchronous>, transform_indices = @transform_1, window_bounds = array<i64: 48, 128>}, {transform_indices = @transform_2, window_bounds = array<i64: 8, 128>}]} {
    %c0 = arith.constant 0 : index
    %c0_0 = arith.constant 0 : index
    %0 = vector.load %arg1[%c0, %c0_0] : memref<8x48xf32, #tpu.memory_space<vmem>>, vector<8x48xf32>
    %c0_1 = arith.constant 0 : index
    %c0_2 = arith.constant 0 : index
    %1 = vector.load %arg2[%c0_1, %c0_2] : memref<48x128xf32, #tpu.memory_space<vmem>>, vector<48x128xf32>
    %cst = arith.constant dense<0.000000e+00> : vector<8x128xf32>
    %2 = tpu.matmul %0, %1, %cst {dimension_numbers = #tpu.dot_dimension_numbers<[1], [0], [0], [1], [0, 0, 1, 1], [], []>} : vector<8x48xf32>, vector<48x128xf32>, vector<8x128xf32> -> vector<8x128xf32>
    %c0_3 = arith.constant 0 : index
    %c0_4 = arith.constant 0 : index
    %3 = vector.load %arg3[%c0_3, %c0_4] : memref<8x128xf32, #tpu.memory_space<vmem>>, vector<8x128xf32>
    tpu.vector_store %arg3[%c0_3, %c0_4], %2 {strides = array<i32>} : memref<8x128xf32, #tpu.memory_space<vmem>>, vector<8x128xf32>,
    return
  }
  func.func @transform_0(%arg0: i32) -> (i32, i32) {
    %c0_i32 = arith.constant 0 : i32
    %c0_i32_0 = arith.constant 0 : i32
    return %arg0, %c0_i32 : i32, i32
  }
  func.func @transform_1(%arg0: i32) -> (i32, i32) {
    %c0_i32 = arith.constant 0 : i32
    %c0_i32_0 = arith.constant 0 : i32
    %c0_i32_1 = arith.constant 0 : i32
    return %c0_i32, %c0_i32_0 : i32, i32
  }
  func.func @transform_2(%arg0: i32) -> (i32, i32) {
    %c0_i32 = arith.constant 0 : i32
    %c0_i32_0 = arith.constant 0 : i32
    return %arg0, %c0_i32 : i32, i32
  }
}

</mosaic_0001>

<bundles_post_ra>
// kernel: nnlinear_forward.1
= control target key start
LH: loop header
LB: loop body
LE: loop exit
PB: predicated region body
PF: predicated region fallthrough
CT: control target
= control target key end

     0   :  { %7 = vsyncpa [#allocation3], 0  ;;  %s94_s12 = smov [#allocation2]   ;;  %s95_s14 = smov 128   ;;  %s121_s0 = inlined_call_operand.vmem [shape: f32[8,48], index: 0, kind: input, shape index: {}]   ;;  %s122_s1 = inlined_call_operand.hbm [shape: f32[48,128], index: 1, kind: input, shape index: {}]   ;;  %s123_s2 = inlined_call_operand.vmem [shape: f32[8,128], index: 2, kind: output, shape index: {}]  }
   0x1   :  { %s14_s11 = sshll.u32 %s122_s1, 4  ;;  %s16_s13 = sshll.u32 %s94_s12, 4  ;;  %s15_s11 = int_to_ptr.hbm [resolvable:$true] %s14_s11  ;;  %s17_s13 = int_to_ptr.vmem [resolvable:$true] %s16_s13 }
   0x2   :  { %s96_s15 = smov 8  }
   0x3   :  { %22 = dma.hbm_to_vmem [thread:$0]  %s15_s11, 768, %s17_s13, [#allocation3], %s95_s14, %s95_s14, %s96_s15  }
   0x4   :  { %92 = dma.done.wait [#allocation3], 768  }
   0x5   :  { %93 = vsyncadd [#allocation3], 4294966528  ;;  %v33_v0 = vld [vmem:[#allocation2 + $0x28] sm:$0xff]  ;;  %v32_v1 = vld [vmem:[#allocation2 + $0x20] sm:$0xff]  ;;  %vm34_vm0 = vcmask 392192  }
   0x6   :  { %48 = vmatpush.msra.mxu0 %v33_v0  ;;  %v31_v2 = vld [vmem:[#allocation2 + $0x18] sm:$0xff]  ;;  %v30_v3 = vld [vmem:[#allocation2 + $0x10] sm:$0xff]  ;;  %v29_v4 = vld [vmem:[#allocation2 + $0x8] sm:$0xff] }
   0x7   :  { %v28_v5 = vld [vmem:[#allocation2] sm:$0xff] }
   0x8   :  { %49 = vmatpush.msra.mxu0 %v32_v1  ;;  %v27_v6 = vld [vmem:[%s121_s0] sm:$0xff] }
   0xa   :  { %50 = vmatpush.msra.mxu0 %v31_v2 }
   0xc   :  { %51 = vmatpush.msra.mxu0 %v30_v3 }
   0xe   :  { %52 = vmatpush.msra.mxu0 %v29_v4 }
  0x10   :  { %53 = vmatpush.msra.mxu0 %v28_v5 }
  0x11   :  { %64 = vmatmul.msk.f32.vlgmr.msra.gmra.mxu0 %vm34_vm0, %v27_v6 }
  0x8e   :  { %v55_v7 = vpop.f32.mrf.mxu0 }
  0x8f   :  { %58 = vst [vmem:[%s123_s2] sm:$0xff] %v55_v7 }
  0x90   :  { %63 = vsyncpa [#allocation3], 1 }

</bundles_post_ra>
